<compile_context>
chip_gen: v7x
topology: tpu7x:2x2x1
jax: 0.10.0
libtpu: 0.0.40
codegen_flags: <defaults>
</compile_context>

<pallas_src>
import math
import functools

import jax
import jax.numpy as jnp
import numpy as np
from jax.experimental import pallas as pl


def _mhsa_kernel(x_ref, vecs_ref, wkqv_ref, wout_ref, out_ref,
                 *, B, S, H, Dh, scale, eps):
    D = H * Dh
    BS = B * S
    G = B * H                     # flattened (head, batch) pairs, g = h*B + b

    x = x_ref[...]                                                # (B*S, D) fp32

    # --- packed small vectors: one (8, 3D) operand, row-indexed --------------
    gamma = vecs_ref[0:1, 0:D]                                    # (1, D)
    beta = vecs_ref[1:2, 0:D]                                     # (1, D)
    b_kqv = vecs_ref[2:3, :]                                      # (1, 3D) (head-interleaved)
    b_out = vecs_ref[3:4, 0:D]                                    # (1, D)

    # --- LayerNorm(d_model) on the whole (B*S, D) slab -----------------------
    mu = jnp.mean(x, axis=-1, keepdims=True)
    xc = x - mu
    var = jnp.mean(xc * xc, axis=-1, keepdims=True)
    xn = xc * jax.lax.rsqrt(var + eps) * gamma + beta

    # --- ONE fused kqv projection (head-interleaved columns) -----------------
    # column layout: [h0: k(Dh) q(Dh) v(Dh) | h1: ... | ...]
    kqv = jnp.dot(xn, wkqv_ref[...],
                  preferred_element_type=jnp.float32) + b_kqv      # (B*S, 3D)

    # --- single head-split relayout:  (B*S, H*3Dh) -> (H*B, S, 3Dh) ----------
    # 4 per-head lane slices + 1 stack (the minimal lane->major move), done once
    # on the fused tensor; leading-dim reshapes are layout-free.
    kqv3 = jnp.stack(
        [kqv[:, h * 3 * Dh:(h + 1) * 3 * Dh].reshape(B, S, 3 * Dh)
         for h in range(H)],
        axis=0).reshape(G, S, 3 * Dh)                              # g = h*B + b

    k3 = kqv3[..., 0:Dh]            # (G, S, Dh)  K[b*S+i, h*Dh+d]
    q3 = kqv3[..., Dh:2 * Dh]       # (G, S, Dh)  Q[b*S+i, h*Dh+j]
    v3 = kqv3[..., 2 * Dh:3 * Dh]   # (G, S, Dh)  V[b*S+j, h*Dh+d]

    # per-head transposed key blocks: one batched minor-2D transpose
    kT3 = jnp.swapaxes(k3, 1, 2)    # (G, Dh, S) = K[b*S+j, h*Dh+i] at [g, i, j]

    # --- reference "attention": ELEMENTWISE q * k^T (legal because S == Dh) --
    score = q3 * kT3 * scale                                       # (G, S, S)

    # Stable softmax over the last axis, one pass for all (batch, head) pairs.
    m = jnp.max(score, axis=-1, keepdims=True)
    p = jnp.exp(score - m)
    l = jnp.sum(p, axis=-1, keepdims=True)
    attn = p * pl.reciprocal(l, approx=False)      # attn_dropout == identity

    # One batched matmul for all (batch, head) pairs.
    o3 = jnp.einsum('gij,gjd->gid', attn, v3,
                    preferred_element_type=jnp.float32)            # (G, S, Dh)

    # --- out-projection without any ctx scratch / scatter --------------------
    #   attn_out = b_out + sum_h  o_h @ Wout_h
    # o_h is a free major-axis slice of o3 (g = h*B + b -> rows h*B..h*B+B) and
    # Wout_h a free major-axis read of the pre-reshaped (H, Dh, D) weight, so
    # the head recombination is pure MXU accumulation (no relayout, no stores).
    wout = wout_ref[...]                                           # (H, Dh, D)
    acc = b_out                                                    # (1, D) -> broadcasts
    for h in range(H):
        o_h = o3[h * B:(h + 1) * B].reshape(BS, Dh)                # (B*S, Dh)
        acc = acc + jnp.dot(o_h, wout[h],
                            preferred_element_type=jnp.float32)    # (B*S, D)

    # single full-slab output store
    out_ref[...] = acc.astype(out_ref.dtype)


@functools.partial(jax.jit, static_argnames=("num_heads",))
def multi_headed_self_attention(x, params, *, num_heads):
    """Returns (module_output, attention_path_output).

    module_output == out_dropout(x) == x at inference; it is returned directly
    from the wrapper (no kernel round-trip).  attention_path_output is the
    Pallas-kernel result of the (quirky) attention math up to out_proj.
    """
    B, S, D = x.shape
    assert D % num_heads == 0, "`d_model` should be divisible by `num_heads`"
    H = num_heads
    Dh = D // H
    assert S == Dh, (
        "torch.mul(query, key) in the reference only broadcasts when seq_len == d_head")
    scale = 1.0 / math.sqrt(Dh)

    # ---- wrapper-side (free) parameter repacking -----------------------------
    w_kqv, b_kqv = params["w_kqv"], params["b_kqv"]               # (D,3D), (1,3D)

    # Head-interleave the fused kqv columns so the kernel's head split is a
    # single contiguous slice per head:  col = h*(3*Dh) + t*Dh + d, t=0/1/2 -> k/q/v.
    w_perm = jnp.stack(
        [w_kqv[:, 0:D].reshape(D, H, Dh),          # K columns
         w_kqv[:, D:2 * D].reshape(D, H, Dh),      # Q columns
         w_kqv[:, 2 * D:3 * D].reshape(D, H, Dh)],  # V columns
        axis=2).reshape(D, 3 * D)
    b_perm = jnp.stack(
        [b_kqv[:, 0:D].reshape(1, H, Dh),
         b_kqv[:, D:2 * D].reshape(1, H, Dh),
         b_kqv[:, 2 * D:3 * D].reshape(1, H, Dh)],
        axis=2).reshape(1, 3 * D)

    # Pack all small vectors into ONE sublane-stacked operand (one DMA):
    #   row 0: gamma, row 1: beta, row 2: b_kqv (interleaved), row 3: b_out.
    vecs = jnp.zeros((8, 3 * D), jnp.float32)
    vecs = vecs.at[0, 0:D].set(params["gamma"][0])
    vecs = vecs.at[1, 0:D].set(params["beta"][0])
    vecs = vecs.at[2, :].set(b_perm[0])
    vecs = vecs.at[3, 0:D].set(params["b_out"][0])

    # Out-projection weight pre-split per head: (D, D) -> (H, Dh, D) (free reshape).
    w_out3 = params["w_out"].reshape(H, Dh, D)

    kernel = functools.partial(_mhsa_kernel, B=B, S=S, H=H, Dh=Dh,
                               scale=scale, eps=1e-5)

    # Single invocation, no grid (per-grid-step overhead dominates at these
    # shapes), no scratch; 4 operands total, everything lives in VMEM.
    attn_out = pl.pallas_call(
        kernel,
        out_shape=jax.ShapeDtypeStruct((B * S, D), x.dtype),
    )(x.reshape(B * S, D), vecs, w_perm, w_out3)

    return x, attn_out.reshape(B, S, D)


def init_params(key, d_model, num_heads):
    d_head = d_model // num_heads
    ks = jax.random.split(key, 8)
    xavier = lambda k, shape: (jax.random.uniform(k, shape, jnp.float32, -1.0, 1.0)
                               * math.sqrt(6.0 / (shape[0] + shape[-1])))
    params = {
        "gamma": jnp.ones((1, d_model), jnp.float32),
        "beta": jnp.zeros((1, d_model), jnp.float32),
        # stored already transposed: (in, out), so kernel does x @ W
        "w_kqv": xavier(ks[0], (d_model, 3 * d_model)),
        "b_kqv": jax.random.normal(ks[1], (1, 3 * d_model), jnp.float32) * 0.02,
        "w_out": xavier(ks[2], (d_model, d_model)),
        "b_out": jax.random.normal(ks[3], (1, d_model), jnp.float32) * 0.02,
        # present in __init__ but unused by the reference forward:
        "w_pos": xavier(ks[4], (d_model, d_model)),
        "b_pos": jnp.zeros((1, d_model), jnp.float32),
        "u_bias": xavier(ks[5], (num_heads, d_head)),
        "v_bias": xavier(ks[6], (num_heads, d_head)),
    }
    return params


def _reference_attention_path(x, p, num_heads):
    """Pure-JAX mirror of the reference math, up to (and including) out_proj."""
    B, S, D = x.shape
    Dh = D // num_heads
    mu = x.mean(-1, keepdims=True)
    var = ((x - mu) ** 2).mean(-1, keepdims=True)
    xn = (x - mu) / jnp.sqrt(var + 1e-5) * p["gamma"][0] + p["beta"][0]
    kqv = xn @ p["w_kqv"] + p["b_kqv"][0]
    key, query, value = jnp.split(kqv, 3, axis=-1)
    key = key.reshape(B, S, num_heads, Dh).transpose(0, 2, 3, 1)      # (B,H,Dh,S)
    query = query.reshape(B, S, num_heads, Dh).transpose(0, 2, 1, 3)  # (B,H,S,Dh)
    value = value.reshape(B, S, num_heads, Dh).transpose(0, 2, 1, 3)  # (B,H,S,Dh)
    score = query * key * (1.0 / math.sqrt(Dh))                       # elementwise!
    attn = jax.nn.softmax(score, axis=-1)
    out = jnp.einsum("bhij,bhjd->bhid", attn, value)
    out = out.transpose(0, 2, 1, 3).reshape(B, S, D)
    return out @ p["w_out"] + p["b_out"][0]


if __name__ == "__main__":
    batch, num_heads, d_model = 2, 4, 32
    d_head = d_model // num_heads
    seq_len = d_head  # required by the reference's elementwise torch.mul broadcast

    root = jax.random.PRNGKey(0)
    kx, kp = jax.random.split(root)
    x = jax.random.normal(kx, (batch, seq_len, d_model), jnp.float32)
    params = init_params(kp, d_model, num_heads)

    out, attn_out = multi_headed_self_attention(x, params, num_heads=num_heads)
    out = jax.block_until_ready(out)
    attn_out = jax.block_until_ready(attn_out)

    # Module output is out_dropout(x) == x at inference.
    np.testing.assert_allclose(np.asarray(out), np.asarray(x), rtol=1e-6, atol=1e-6)
    # Attention-path output matches the pure-JAX reference of the same math.
    ref = _reference_attention_path(x, params, num_heads)
    np.testing.assert_allclose(np.asarray(attn_out), np.asarray(ref), rtol=1e-5, atol=1e-5)

    print("KERNEL_OK")
</pallas_src>

<mosaic_0001>
module attributes {stable_mosaic.version = 11 : i64} {
  func.func @_mhsa_kernel(%arg0: memref<16x32xf32, #tpu.memory_space<vmem>>, %arg1: memref<8x96xf32, #tpu.memory_space<vmem>>, %arg2: memref<32x96xf32, #tpu.memory_space<vmem>>, %arg3: memref<4x8x32xf32, #tpu.memory_space<vmem>>, %arg4: memref<16x32xf32, #tpu.memory_space<vmem>>) attributes {dimension_semantics = [], scalar_prefetch = 0 : i64, scratch_operands = 0 : i64, tpu.core_type = #tpu.core_type<tc>} {
    %c0 = arith.constant 0 : index
    %c0_0 = arith.constant 0 : index
    %0 = vector.load %arg0[%c0, %c0_0] : memref<16x32xf32, #tpu.memory_space<vmem>>, vector<16x32xf32>
    %c0_1 = arith.constant 0 : index
    %c0_2 = arith.constant 0 : index
    %1 = vector.load %arg1[%c0_1, %c0_2] : memref<8x96xf32, #tpu.memory_space<vmem>>, vector<1x32xf32>
    %c1 = arith.constant 1 : index
    %c0_3 = arith.constant 0 : index
    %2 = vector.load %arg1[%c1, %c0_3] : memref<8x96xf32, #tpu.memory_space<vmem>>, vector<1x32xf32>
    %c2 = arith.constant 2 : index
    %c0_4 = arith.constant 0 : index
    %3 = vector.load %arg1[%c2, %c0_4] : memref<8x96xf32, #tpu.memory_space<vmem>>, vector<1x96xf32>
    %c3 = arith.constant 3 : index
    %c0_5 = arith.constant 0 : index
    %4 = vector.load %arg1[%c3, %c0_5] : memref<8x96xf32, #tpu.memory_space<vmem>>, vector<1x32xf32>
    %cst = arith.constant dense<0.000000e+00> : vector<16xf32>
    %5 = vector.multi_reduction <add>, %0, %cst [1] : vector<16x32xf32> to vector<16xf32>
    %6 = vector.shape_cast %5 : vector<16xf32> to vector<16x1xf32>
    %cst_6 = arith.constant 3.200000e+01 : f32
    %7 = vector.broadcast %cst_6 : f32 to vector<16x1xf32>
    %8 = arith.divf %6, %7 : vector<16x1xf32>
    %9 = vector.broadcast %8 : vector<16x1xf32> to vector<16x32xf32>
    %10 = arith.subf %0, %9 : vector<16x32xf32>
    %11 = arith.mulf %10, %10 : vector<16x32xf32>
    %cst_7 = arith.constant dense<0.000000e+00> : vector<16xf32>
    %12 = vector.multi_reduction <add>, %11, %cst_7 [1] : vector<16x32xf32> to vector<16xf32>
    %13 = vector.shape_cast %12 : vector<16xf32> to vector<16x1xf32>
    %cst_8 = arith.constant 3.200000e+01 : f32
    %14 = vector.broadcast %cst_8 : f32 to vector<16x1xf32>
    %15 = arith.divf %13, %14 : vector<16x1xf32>
    %cst_9 = arith.constant 9.99999974E-6 : f32
    %16 = vector.broadcast %cst_9 : f32 to vector<16x1xf32>
    %17 = arith.addf %15, %16 : vector<16x1xf32>
    %18 = math.rsqrt %17 : vector<16x1xf32>
    %19 = vector.broadcast %18 : vector<16x1xf32> to vector<16x32xf32>
    %20 = arith.mulf %10, %19 : vector<16x32xf32>
    %21 = vector.broadcast %1 : vector<1x32xf32> to vector<16x32xf32>
    %22 = arith.mulf %20, %21 : vector<16x32xf32>
    %23 = vector.broadcast %2 : vector<1x32xf32> to vector<16x32xf32>
    %24 = arith.addf %22, %23 : vector<16x32xf32>
    %c0_10 = arith.constant 0 : index
    %c0_11 = arith.constant 0 : index
    %25 = vector.load %arg2[%c0_10, %c0_11] : memref<32x96xf32, #tpu.memory_space<vmem>>, vector<32x96xf32>
    %cst_12 = arith.constant dense<0.000000e+00> : vector<16x96xf32>
    %26 = tpu.matmul %24, %25, %cst_12 {dimension_numbers = #tpu.dot_dimension_numbers<[1], [0], [0], [1], [0, 0, 1, 1], [], []>} : vector<16x32xf32>, vector<32x96xf32>, vector<16x96xf32> -> vector<16x96xf32>
    %27 = vector.broadcast %3 : vector<1x96xf32> to vector<16x96xf32>
    %28 = arith.addf %26, %27 : vector<16x96xf32>
    %29 = vector.extract_strided_slice %28 {offsets = [0, 0], sizes = [16, 24], strides = [1, 1]} : vector<16x96xf32> to vector<16x24xf32>
    %30 = vector.shape_cast %29 : vector<16x24xf32> to vector<2x8x24xf32>
    %31 = vector.extract_strided_slice %28 {offsets = [0, 24], sizes = [16, 24], strides = [1, 1]} : vector<16x96xf32> to vector<16x24xf32>
    %32 = vector.shape_cast %31 : vector<16x24xf32> to vector<2x8x24xf32>
    %33 = vector.extract_strided_slice %28 {offsets = [0, 48], sizes = [16, 24], strides = [1, 1]} : vector<16x96xf32> to vector<16x24xf32>
    %34 = vector.shape_cast %33 : vector<16x24xf32> to vector<2x8x24xf32>
    %35 = vector.extract_strided_slice %28 {offsets = [0, 72], sizes = [16, 24], strides = [1, 1]} : vector<16x96xf32> to vector<16x24xf32>
    %36 = vector.shape_cast %35 : vector<16x24xf32> to vector<2x8x24xf32>
    %37 = vector.shape_cast %30 : vector<2x8x24xf32> to vector<1x2x8x24xf32>
    %38 = vector.shape_cast %32 : vector<2x8x24xf32> to vector<1x2x8x24xf32>
    %39 = vector.shape_cast %34 : vector<2x8x24xf32> to vector<1x2x8x24xf32>
    %40 = vector.shape_cast %36 : vector<2x8x24xf32> to vector<1x2x8x24xf32>
    %41 = tpu.concatenate %37, %38, %39, %40 in 0 : vector<1x2x8x24xf32>, vector<1x2x8x24xf32>, vector<1x2x8x24xf32>, vector<1x2x8x24xf32> -> vector<4x2x8x24xf32>
    %42 = vector.shape_cast %41 : vector<4x2x8x24xf32> to vector<8x8x24xf32>
    %43 = vector.extract_strided_slice %42 {offsets = [0, 0, 0], sizes = [8, 8, 8], strides = [1, 1, 1]} : vector<8x8x24xf32> to vector<8x8x8xf32>
    %44 = vector.extract_strided_slice %42 {offsets = [0, 0, 8], sizes = [8, 8, 8], strides = [1, 1, 1]} : vector<8x8x24xf32> to vector<8x8x8xf32>
    %45 = vector.extract_strided_slice %42 {offsets = [0, 0, 16], sizes = [8, 8, 8], strides = [1, 1, 1]} : vector<8x8x24xf32> to vector<8x8x8xf32>
    %46 = tpu.transpose %43, [0, 2, 1] : vector<8x8x8xf32> -> vector<8x8x8xf32>
    %47 = arith.mulf %44, %46 : vector<8x8x8xf32>
    %cst_13 = arith.constant 0.353553385 : f32
    %48 = vector.broadcast %cst_13 : f32 to vector<8x8x8xf32>
    %49 = arith.mulf %47, %48 : vector<8x8x8xf32>
    %cst_14 = arith.constant dense<0xFF800000> : vector<8x8xf32>
    %50 = vector.multi_reduction <maximumf>, %49, %cst_14 [2] : vector<8x8x8xf32> to vector<8x8xf32>
    %51 = vector.shape_cast %50 : vector<8x8xf32> to vector<8x8x1xf32>
    %52 = vector.broadcast %51 : vector<8x8x1xf32> to vector<8x8x8xf32>
    %53 = arith.subf %49, %52 : vector<8x8x8xf32>
    %54 = math.exp %53 : vector<8x8x8xf32>
    %cst_15 = arith.constant dense<0.000000e+00> : vector<8x8xf32>
    %55 = vector.multi_reduction <add>, %54, %cst_15 [2] : vector<8x8x8xf32> to vector<8x8xf32>
    %56 = vector.shape_cast %55 : vector<8x8xf32> to vector<8x8x1xf32>
    %57 = tpu.reciprocal %56 : vector<8x8x1xf32> -> vector<8x8x1xf32>
    %58 = vector.broadcast %57 : vector<8x8x1xf32> to vector<8x8x8xf32>
    %59 = arith.mulf %54, %58 : vector<8x8x8xf32>
    "tpu.trace_start"() <{level = 10 : i32, message = "gij,gjd->gid"}> : () -> ()
    %cst_16 = arith.constant dense<0.000000e+00> : vector<8x8x8xf32>
    %60 = tpu.matmul %59, %45, %cst_16 {dimension_numbers = #tpu.dot_dimension_numbers<[2], [1], [1], [2], [0, 0, 0, 1, 1, 2], [0], [0]>} : vector<8x8x8xf32>, vector<8x8x8xf32>, vector<8x8x8xf32> -> vector<8x8x8xf32>
    "tpu.trace_stop"() : () -> ()
    %c0_17 = arith.constant 0 : index
    %c0_18 = arith.constant 0 : index
    %c0_19 = arith.constant 0 : index
    %61 = vector.load %arg3[%c0_17, %c0_18, %c0_19] : memref<4x8x32xf32, #tpu.memory_space<vmem>>, vector<4x8x32xf32>
    %62 = vector.extract_strided_slice %60 {offsets = [0, 0, 0], sizes = [2, 8, 8], strides = [1, 1, 1]} : vector<8x8x8xf32> to vector<2x8x8xf32>
    %63 = vector.shape_cast %62 : vector<2x8x8xf32> to vector<16x8xf32>
    %64 = vector.extract_strided_slice %61 {offsets = [0, 0, 0], sizes = [1, 8, 32], strides = [1, 1, 1]} : vector<4x8x32xf32> to vector<1x8x32xf32>
    %65 = vector.shape_cast %64 : vector<1x8x32xf32> to vector<8x32xf32>
    %cst_20 = arith.constant dense<0.000000e+00> : vector<16x32xf32>
    %66 = tpu.matmul %63, %65, %cst_20 {dimension_numbers = #tpu.dot_dimension_numbers<[1], [0], [0], [1], [0, 0, 1, 1], [], []>} : vector<16x8xf32>, vector<8x32xf32>, vector<16x32xf32> -> vector<16x32xf32>
    %67 = vector.broadcast %4 : vector<1x32xf32> to vector<16x32xf32>
    %68 = arith.addf %67, %66 : vector<16x32xf32>
    %69 = vector.extract_strided_slice %60 {offsets = [2, 0, 0], sizes = [2, 8, 8], strides = [1, 1, 1]} : vector<8x8x8xf32> to vector<2x8x8xf32>
    %70 = vector.shape_cast %69 : vector<2x8x8xf32> to vector<16x8xf32>
    %71 = vector.extract_strided_slice %61 {offsets = [1, 0, 0], sizes = [1, 8, 32], strides = [1, 1, 1]} : vector<4x8x32xf32> to vector<1x8x32xf32>
    %72 = vector.shape_cast %71 : vector<1x8x32xf32> to vector<8x32xf32>
    %cst_21 = arith.constant dense<0.000000e+00> : vector<16x32xf32>
    %73 = tpu.matmul %70, %72, %cst_21 {dimension_numbers = #tpu.dot_dimension_numbers<[1], [0], [0], [1], [0, 0, 1, 1], [], []>} : vector<16x8xf32>, vector<8x32xf32>, vector<16x32xf32> -> vector<16x32xf32>
    %74 = arith.addf %68, %73 : vector<16x32xf32>
    %75 = vector.extract_strided_slice %60 {offsets = [4, 0, 0], sizes = [2, 8, 8], strides = [1, 1, 1]} : vector<8x8x8xf32> to vector<2x8x8xf32>
    %76 = vector.shape_cast %75 : vector<2x8x8xf32> to vector<16x8xf32>
    %77 = vector.extract_strided_slice %61 {offsets = [2, 0, 0], sizes = [1, 8, 32], strides = [1, 1, 1]} : vector<4x8x32xf32> to vector<1x8x32xf32>
    %78 = vector.shape_cast %77 : vector<1x8x32xf32> to vector<8x32xf32>
    %cst_22 = arith.constant dense<0.000000e+00> : vector<16x32xf32>
    %79 = tpu.matmul %76, %78, %cst_22 {dimension_numbers = #tpu.dot_dimension_numbers<[1], [0], [0], [1], [0, 0, 1, 1], [], []>} : vector<16x8xf32>, vector<8x32xf32>, vector<16x32xf32> -> vector<16x32xf32>
    %80 = arith.addf %74, %79 : vector<16x32xf32>
    %81 = vector.extract_strided_slice %60 {offsets = [6, 0, 0], sizes = [2, 8, 8], strides = [1, 1, 1]} : vector<8x8x8xf32> to vector<2x8x8xf32>
    %82 = vector.shape_cast %81 : vector<2x8x8xf32> to vector<16x8xf32>
    %83 = vector.extract_strided_slice %61 {offsets = [3, 0, 0], sizes = [1, 8, 32], strides = [1, 1, 1]} : vector<4x8x32xf32> to vector<1x8x32xf32>
    %84 = vector.shape_cast %83 : vector<1x8x32xf32> to vector<8x32xf32>
    %cst_23 = arith.constant dense<0.000000e+00> : vector<16x32xf32>
    %85 = tpu.matmul %82, %84, %cst_23 {dimension_numbers = #tpu.dot_dimension_numbers<[1], [0], [0], [1], [0, 0, 1, 1], [], []>} : vector<16x8xf32>, vector<8x32xf32>, vector<16x32xf32> -> vector<16x32xf32>
    %86 = arith.addf %80, %85 : vector<16x32xf32>
    %c0_24 = arith.constant 0 : index
    %c0_25 = arith.constant 0 : index
    %87 = vector.load %arg4[%c0_24, %c0_25] : memref<16x32xf32, #tpu.memory_space<vmem>>, vector<16x32xf32>
    tpu.vector_store %arg4[%c0_24, %c0_25], %86 {strides = array<i32>} : memref<16x32xf32, #tpu.memory_space<vmem>>, vector<16x32xf32>,
    return
  }
}

</mosaic_0001>

<bundles_post_ra>
// kernel: multi_headed_self_attention.1
= control target key start
LH: loop header
LB: loop body
LE: loop exit
PB: predicated region body
PF: predicated region fallthrough
CT: control target
= control target key end

     0   :  { %vm24_vm0 = vcmask 261120   ;;  %s2050_s0 = inlined_call_operand.vmem [shape: f32[16,32], index: 0, kind: input, shape index: {}]   ;;  %s2051_s1 = inlined_call_operand.vmem [shape: f32[8,96], index: 1, kind: input, shape index: {}]   ;;  %s2052_s2 = inlined_call_operand.vmem [shape: f32[32,96], index: 2, kind: input, shape index: {}]   ;;  %s2053_s3 = inlined_call_operand.vmem [shape: f32[4,8,32], index: 3, kind: input, shape index: {}]   ;;  %s2054_s4 = inlined_call_operand.hbm [shape: f32[16,32], index: 4, kind: output, shape index: {}]  }
   0x1   :  { %v18_v0 = vld [vmem:[%s2050_s0] sm:$0xff]  ;;  %v19_v1 = vld [vmem:[%s2050_s0 + $0x8] sm:$0xff] }
   0x2   :  { %9 = vsyncpa [#allocation3], 0  ;;  %v25_v2 = vsel %vm24_vm0, %v18_v0, 0.0  ;;  %v28_v3 = vsel %vm24_vm0, %v19_v1, 0.0  ;;  %v64_v14 = vld [vmem:[%s2052_s2] sm:$0xff]  ;;  %v65_v15 = vld [vmem:[%s2052_s2 + $0x8] sm:$0xff] }
   0x3   :  { %26 = vadd.xlane.f32.xlu0 %v25_v2  ;;  %v66_v16 = vld [vmem:[%s2052_s2 + $0x10] sm:$0xff]  ;;  %v1708_v17 = vpack.c.bf16 %v65_v15, %v64_v14  ;;  %v67_v18 = vld [vmem:[%s2052_s2 + $0x18] sm:$0xff]  ;;  %v1581_v27 = vld [vmem:[%s2051_s1] ss:$0 sm:$0xff]  ;;  %s1794_s5 = smov 104   ;;  %s1795_s6 = smov 80  }
   0x4   :  { %v1712_v19 = vpack.c.bf16 %v67_v18, %v66_v16  ;;  %v1582_v29 = vld [vmem:[%s2051_s1 + $0x1] ss:$0 sm:$0xff]  ;;  %v1583_v36 = vld [vmem:[%s2051_s1 + $0x2] ss:$0 sm:$0xff]  ;;  %s1796_s7 = smov 56   ;;  %s1797_s8 = smov 8  }
   0x5   :  { %1709 = vmatprep.subr.bf16.mxu0 %v1708_v17  ;;  %vm477_vm1 = vcmask 130112   ;;  %s1798_s9 = smov 120   ;;  %vm558_vm2 = vcmask 64512   ;;  %s1800_s10 = smov 112   ;;  %vm1801_vm3 = vmmov 0  }
   0x6   :  { %1711 = vmatpush3.bf16.msra.mxu0 %v1708_v17  ;;  %s1802_s19 = smov [#allocation2]  }
   0x7   :  { %29 = vadd.xlane.f32.xlu0 %v28_v3  ;;  %1713 = vmatprep.subr.bf16.mxu0 %v1712_v19  ;;  %s1570_s20 = sshll.u32 %s1802_s19, 4  ;;  %s1571_s20 = int_to_ptr.vmem [resolvable:$true] %s1570_s20 }
   0x8   :  { %s1770_s21 = scalar_lea.vmem %s1571_s20, 256  ;;  %p1775_p1 = scmp.lt.s32.totalorder %s1571_s20, %s1571_s20 }
   0x9   :  { %p1771_p0 = scmp.ne.s32.totalorder %s1571_s20, %s1770_s21  ;;  %p1776_p2 = scmp.lt.s32.totalorder %s1770_s21, %s1770_s21 }
   0xa   :  { %1715 = vmatpush3.bf16.msra.mxu0 %v1712_v19 }
   0xb   :  { %p1777_p3 = por %p1776_p2, %p1775_p1 }
   0xd   :  { %p1778_p4 = pnand %p1777_p3, %p1771_p0 }
  0x90   :  { %v27_v4 = vpop.xlane.xlu0 %26 }
  0x91   :  { %v32_v5 = vmul.f32 0.03125, %v27_v4 }
  0x93   :  { %v34_v6 = vsub.f32 %v18_v0, %v32_v5 }
  0x94   :  { %v30_v7 = vpop.xlane.xlu0 %29 }
  0x95   :  { %v33_v8 = vmul.f32 0.03125, %v30_v7  ;;  %v36_v9 = vmul.f32 %v34_v6, %v34_v6 }
  0x97   :  { %v35_v10 = vsub.f32 %v19_v1, %v33_v8  ;;  %v38_v11 = vsel %vm24_vm0, %v36_v9, 0.0 }
  0x98   :  { %39 = vadd.xlane.f32.xlu1 %v38_v11 }
  0x99   :  { %v37_v12 = vmul.f32 %v35_v10, %v35_v10 }
  0x9b   :  { %v41_v13 = vsel %vm24_vm0, %v37_v12, 0.0 }
  0x9c   :  { %42 = vadd.xlane.f32.xlu1 %v41_v13 }
 0x125   :  { %v40_v20 = vpop.xlane.xlu1 %39 }
 0x126   :  { %v44_v21 = vmul.f32 0.03125, %v40_v20 }
 0x128   :  { %v46_v22 = vadd.f32 1e-05, %v44_v21 }
 0x129   :  { %v43_v23 = vpop.xlane.xlu1 %42 }
 0x12a   :  { %1734 = vrsqrt.f32 %v46_v22  ;;  %v45_v24 = vmul.f32 0.03125, %v43_v23 }
 0x12c   :  { %v47_v25 = vadd.f32 1e-05, %v45_v24 }
 0x12e   :  { %1736 = vrsqrt.f32 %v47_v25 }
 0x134   :  { %v1735_v26 = vpop.eup %1734 }
 0x135   :  { %v50_v28 = vmul.f32 %v1735_v26, %v34_v6 }
 0x137   :  { %v56_v30 = vmul.f32 %v1581_v27, %v50_v28 }
 0x138   :  { %v1737_v31 = vpop.eup %1736 }
 0x139   :  { %v51_v32 = vmul.f32 %v1737_v31, %v35_v10  ;;  %v62_v33 = vadd.f32 %v1582_v29, %v56_v30 }
 0x13b   :  { %v57_v34 = vmul.f32 %v1581_v27, %v51_v32  ;;  %1645 = vmatprep.mubr.msk.f32.mxu0 %vm24_vm0, %v62_v33 }
 0x13d   :  { %v63_v35 = vadd.f32 %v1582_v29, %v57_v34 }
 0x13f   :  { %1646 = vmatmul.mubr.msk.f32.vlgmr.msra.gmra.mrb[0].mxu0 %vm24_vm0, %v63_v35 }
 0x212   :  { %v1647_v37 = vpop.f32.mrb[0].mxu0 }
 0x213   :  { %v1862_v38 = vadd.f32 %v1647_v37, %v1583_v36  ;;  %v144_v39 = vpop.f32.mrb[1].mxu0 }
 0x214   :  { %v1864_v40 = vadd.f32 %v1583_v36, %v144_v39 }
 0x215   :  { %157 = vrot.lane.b32.xlu1 %v1862_v38, %s1794_s5 }
 0x216   :  { %155 = vrot.lane.b32.xlu0 %v1864_v40, %s1794_s5 }
 0x219   :  { %163 = vrot.lane.b32.xlu1 %v1862_v38, %s1795_s6 }
 0x21a   :  { %167 = vrot.lane.b32.xlu0 %v1864_v40, %s1796_s7 }
 0x21d   :  { %161 = vrot.lane.b32.xlu1 %v1864_v40, %s1795_s6 }
 0x238   :  { %173 = vxpose.xlu0.b32.start.end [1/1] (short) (narrow) %v1864_v40, 8 }
 0x246   :  { %205 = vxpose.xlu1.b32.start.end [1/1] (short) (narrow) %v1862_v38, 8 }
 0x264   :  { %169 = vrot.lane.b32.xlu1 %v1862_v38, %s1796_s7 }
 0x287   :  { %v1874_v41 = vpop.permute.xlu1 %157 }
 0x288   :  { %269 = vxpose.xlu0.b32.start.end [1/1] (short) (narrow) %v1874_v41, 8  ;;  %v1880_v43 = vpop.permute.xlu0 %155 }
 0x28b   :  { %v1877_v42 = vpop.permute.xlu1 %163 }
 0x28c   :  { %333 = vxpose.xlu0.b32.start.end [1/1] (short) (narrow) %v1877_v42, 8  ;;  %v1882_v44 = vpop.permute.xlu0 %167 }
 0x28f   :  { %v1885_v46 = vpop.permute.xlu1 %161 }
 0x2b8   :  { %v189_v45 = vpop.trf.xlu0 }
 0x2b9   :  { %437 = vrot.lane.b32.xlu1 %v189_v45, %s1797_s8 }
 0x2c6   :  { %v221_v47 = vpop.trf.xlu1 }
 0x2d6   :  { %v1887_v48 = vpop.permute.xlu1 %169 }
 0x2d7   :  { %397 = vxpose.xlu0.b32.start.end [1/1] (short) (narrow) %v1887_v48, 8 }
 0x2db   :  { %237 = vxpose.xlu0.b32.start.end [1/1] (short) (narrow) %v1880_v43, 8 }
 0x2df   :  { %301 = vxpose.xlu0.b32.start.end [1/1] (short) (narrow) %v1885_v46, 8 }
 0x2e2   :  { %365 = vxpose.xlu1.b32.start.end [1/1] (short) (narrow) %v1882_v44, 8 }
 0x308   :  { %439 = vrot.lane.b32.xlu0 %v221_v47, %s1797_s8  ;;  %v285_v49 = vpop.trf.xlu0 }
 0x30c   :  { %v349_v50 = vpop.trf.xlu0 }
 0x32b   :  { %v438_v53 = vpop.permute.xlu1 %437 }
 0x32c   :  { %v461_v56 = vmul.f32 %v438_v53, %v1864_v40 }
 0x32e   :  { %v469_v57 = vmul.f32 0.35355338, %v461_v56 }
 0x330   :  { %v478_v58 = vsel %vm477_vm1, %v469_v57, -inf }
 0x357   :  { %v413_v51 = vpop.trf.xlu0 }
 0x35b   :  { %v253_v52 = vpop.trf.xlu0 }
 0x35c   :  { %441 = vrot.lane.b32.xlu1 %v253_v52, %s1797_s8 }
 0x35f   :  { %v317_v54 = vpop.trf.xlu0 }
 0x360   :  { %443 = vrot.lane.b32.xlu1 %v285_v49, %s1797_s8 }
 0x362   :  { %v381_v55 = vpop.trf.xlu1 }
 0x363   :  { %449 = vrot.lane.b32.xlu0 %v381_v55, %s1797_s8 }
 0x364   :  { %445 = vrot.lane.b32.xlu1 %v317_v54, %s1797_s8 }
 0x368   :  { %447 = vrot.lane.b32.xlu1 %v349_v50, %s1797_s8 }
 0x36c   :  { %451 = vrot.lane.b32.xlu1 %v413_v51, %s1797_s8 }
 0x37a   :  { %v440_v59 = vpop.permute.xlu0 %439 }
 0x37b   :  { %v462_v60 = vmul.f32 %v440_v59, %v1862_v38 }
 0x37d   :  { %v470_v61 = vmul.f32 0.35355338, %v462_v60 }
 0x37f   :  { %v481_v62 = vsel %vm477_vm1, %v470_v61, -inf }
 0x382   :  { %479 = vmax.xlane.f32.xlu0 %v478_v58 }
 0x390   :  { %482 = vmax.xlane.f32.xlu1 %v481_v62 }
 0x3ce   :  { %v442_v63 = vpop.permute.xlu1 %441 }
 0x3cf   :  { %v463_v0 = vmul.f32 %v442_v63, %v1880_v43 }
 0x3d1   :  { %v471_v1 = vmul.f32 0.35355338, %v463_v0 }
 0x3d2   :  { %v444_v2 = vpop.permute.xlu1 %443 }
 0x3d3   :  { %v464_v3 = vmul.f32 %v444_v2, %v1874_v41  ;;  %v484_v4 = vsel %vm477_vm1, %v471_v1, -inf }
 0x3d4   :  { %485 = vmax.xlane.f32.xlu0 %v484_v4 }
 0x3d5   :  { %v472_v5 = vmul.f32 0.35355338, %v464_v3  ;;  %v450_v6 = vpop.permute.xlu0 %449 }
 0x3d6   :  { %v446_v7 = vpop.permute.xlu1 %445  ;;  %v467_v8 = vmul.f32 %v450_v6, %v1882_v44 }
 0x3d7   :  { %v465_v9 = vmul.f32 %v446_v7, %v1885_v46  ;;  %v487_v10 = vsel %vm477_vm1, %v472_v5, -inf }
 0x3d8   :  { %488 = vmax.xlane.f32.xlu0 %v487_v10  ;;  %v475_v13 = vmul.f32 0.35355338, %v467_v8 }
 0x3d9   :  { %v473_v11 = vmul.f32 0.35355338, %v465_v9 }
 0x3da   :  { %v448_v12 = vpop.permute.xlu1 %447  ;;  %v496_v19 = vsel %vm477_vm1, %v475_v13, -inf }
 0x3db   :  { %v466_v14 = vmul.f32 %v448_v12, %v1877_v42  ;;  %v490_v15 = vsel %vm477_vm1, %v473_v11, -inf }
 0x3dc   :  { %491 = vmax.xlane.f32.xlu0 %v490_v15  ;;  %v1799_v15 = vmov 0.0  }
 0x3dd   :  { %v474_v16 = vmul.f32 0.35355338, %v466_v14  ;;  %1648 = vmatprep.subr.mxu0 %v1799_v15  ;;  %1658 = vmatprep.subr.mxu1 %v1799_v15 }
 0x3de   :  { %v452_v17 = vpop.permute.xlu1 %451  ;;  %1650 = vmatprep.mubr.msk.f32.mxu0 %vm1801_vm3, %v1799_v15  ;;  %1660 = vmatprep.mubr.msk.f32.mxu1 %vm1801_vm3, %v1799_v15 }
 0x3df   :  { %v468_v18 = vmul.f32 %v452_v17, %v1887_v48  ;;  %v493_v20 = vsel %vm477_vm1, %v474_v16, -inf }
 0x3e0   :  { %497 = vmax.xlane.f32.xlu0 %v496_v19  ;;  %494 = vmax.xlane.f32.xlu1 %v493_v20 }
 0x3e1   :  { %v476_v21 = vmul.f32 0.35355338, %v468_v18 }
 0x3e3   :  { %v499_v22 = vsel %vm477_vm1, %v476_v21, -inf }
 0x3e4   :  { %500 = vmax.xlane.f32.xlu1 %v499_v22 }
 0x40f   :  { %v480_v23 = vpop.xlane.xlu0 %479 }
 0x410   :  { %v502_v24 = vsub.f32 %v469_v57, %v480_v23 }
 0x412   :  { %v510_v25 = vmul.f32 1.442695, %v502_v24 }
 0x414   :  { %1738 = vpow2.f32 %v510_v25 }
 0x41d   :  { %v483_v26 = vpop.xlane.xlu1 %482 }
 0x41e   :  { %v1916_v27 = vpop.eup %1738  ;;  %v503_v28 = vsub.f32 %v470_v61, %v483_v26 }
 0x41f   :  { %534 = vrot.lane.b32.xlu0 %v1916_v27, %s1798_s9 }
 0x420   :  { %v512_v29 = vmul.f32 1.442695, %v503_v28 }
 0x422   :  { %1740 = vpow2.f32 %v512_v29 }
 0x42c   :  { %v1920_v30 = vpop.eup %1740 }
 0x42d   :  { %536 = vrot.lane.b32.xlu1 %v1920_v30, %s1798_s9 }
 0x461   :  { %v486_v31 = vpop.xlane.xlu0 %485 }
 0x462   :  { %v504_v32 = vsub.f32 %v471_v1, %v486_v31 }
 0x464   :  { %v514_v33 = vmul.f32 1.442695, %v504_v32 }
 0x465   :  { %v489_v34 = vpop.xlane.xlu0 %488 }
 0x466   :  { %1742 = vpow2.f32 %v514_v33  ;;  %v505_v35 = vsub.f32 %v472_v5, %v489_v34 }
 0x468   :  { %v516_v36 = vmul.f32 1.442695, %v505_v35 }
 0x469   :  { %v492_v37 = vpop.xlane.xlu0 %491 }
 0x46a   :  { %1744 = vpow2.f32 %v516_v36  ;;  %v506_v39 = vsub.f32 %v473_v11, %v492_v37 }
 0x46c   :  { %v518_v45 = vmul.f32 1.442695, %v506_v39 }
 0x46d   :  { %v498_v47 = vpop.xlane.xlu0 %497  ;;  %v495_v49 = vpop.xlane.xlu1 %494 }
 0x46e   :  { %1746 = vpow2.f32 %v518_v45  ;;  %v508_v50 = vsub.f32 %v475_v13, %v498_v47  ;;  %v507_v51 = vsub.f32 %v474_v16, %v495_v49 }
 0x470   :  { %v1924_v52 = vpop.eup %1742  ;;  %v522_v53 = vmul.f32 1.442695, %v508_v50  ;;  %v520_v54 = vmul.f32 1.442695, %v507_v51 }
 0x471   :  { %538 = vrot.lane.b32.xlu1 %v1924_v52, %s1798_s9  ;;  %v501_v55 = vpop.xlane.xlu1 %500 }
 0x472   :  { %1748 = vpow2.f32 %v522_v53  ;;  %v509_v56 = vsub.f32 %v476_v21, %v501_v55 }
 0x473   :  { %1750 = vpow2.f32 %v520_v54 }
 0x474   :  { %v1928_v57 = vpop.eup %1744  ;;  %v524_v58 = vmul.f32 1.442695, %v509_v56 }
 0x475   :  { %540 = vrot.lane.b32.xlu1 %v1928_v57, %s1798_s9 }
 0x476   :  { %1752 = vpow2.f32 %v524_v58 }
 0x478   :  { %v1932_v59 = vpop.eup %1746 }
 0x479   :  { %542 = vrot.lane.b32.xlu0 %v1932_v59, %s1798_s9 }
 0x47c   :  { %v1936_v60 = vpop.eup %1748 }
 0x47d   :  { %v1938_v61 = vpop.eup %1750  ;;  %546 = vrot.lane.b32.xlu0 %v1936_v60, %s1798_s9 }
 0x47e   :  { %544 = vrot.lane.b32.xlu1 %v1938_v61, %s1798_s9 }
 0x480   :  { %v1944_v62 = vpop.eup %1752 }
 0x482   :  { %548 = vrot.lane.b32.xlu1 %v1944_v62, %s1798_s9 }
 0x491   :  { %v535_v63 = vpop.permute.xlu0 %534 }
 0x492   :  { %v559_v0 = vsel %vm558_vm2, %v535_v63, 0.0 }
 0x49c   :  { %560 = vadd.xlane.f32.xlu0 %v559_v0 }
 0x49f   :  { %v537_v1 = vpop.permute.xlu1 %536 }
 0x4a0   :  { %v562_v2 = vsel %vm558_vm2, %v537_v1, 0.0 }
 0x4a6   :  { %563 = vadd.xlane.f32.xlu1 %v562_v2  ;;  %v1226_v2 = vld [vmem:[%s2053_s3 + $0x18] sm:$0xff] }
 0x4e3   :  { %v539_v3 = vpop.permute.xlu1 %538 }
 0x4e4   :  { %v565_v4 = vsel %vm558_vm2, %v539_v3, 0.0 }
 0x4e5   :  { %566 = vadd.xlane.f32.xlu0 %v565_v4 }
 0x4e7   :  { %v541_v5 = vpop.permute.xlu1 %540 }
 0x4e8   :  { %v568_v6 = vsel %vm558_vm2, %v541_v5, 0.0 }
 0x4e9   :  { %569 = vadd.xlane.f32.xlu0 %v568_v6 }
 0x4eb   :  { %v543_v7 = vpop.permute.xlu0 %542 }
 0x4ec   :  { %v571_v8 = vsel %vm558_vm2, %v543_v7, 0.0 }
 0x4ed   :  { %572 = vadd.xlane.f32.xlu0 %v571_v8 }
 0x4ef   :  { %v547_v9 = vpop.permute.xlu0 %546 }
 0x4f0   :  { %v545_v10 = vpop.permute.xlu1 %544  ;;  %v577_v11 = vsel %vm558_vm2, %v547_v9, 0.0 }
 0x4f1   :  { %578 = vadd.xlane.f32.xlu0 %v577_v11  ;;  %v574_v12 = vsel %vm558_vm2, %v545_v10, 0.0 }
 0x4f2   :  { %575 = vadd.xlane.f32.xlu1 %v574_v12  ;;  %v1596_v12 = vld [vmem:[%s2051_s1 + $0x3] ss:$0 sm:$0xff] }
 0x4f4   :  { %v549_v13 = vpop.permute.xlu1 %548 }
 0x4f5   :  { %v580_v14 = vsel %vm558_vm2, %v549_v13, 0.0 }
 0x4f6   :  { %581 = vadd.xlane.f32.xlu1 %v580_v14 }
 0x507   :  { %680 = vrot.lane.b32.xlu1 %v1862_v38, %s1800_s10  ;;  %602 = vrot.lane.b32.xlu0 %v1864_v40, %s1800_s10 }
 0x50b   :  { %758 = vrot.lane.b32.xlu0 %v1880_v43, %s1800_s10 }
 0x50f   :  { %836 = vrot.lane.b32.xlu0 %v1874_v41, %s1800_s10 }
 0x513   :  { %914 = vrot.lane.b32.xlu0 %v1885_v46, %s1800_s10 }
 0x517   :  { %992 = vrot.lane.b32.xlu0 %v1877_v42, %s1800_s10 }
 0x51b   :  { %1070 = vrot.lane.b32.xlu0 %v1882_v44, %s1800_s10 }
 0x51f   :  { %1148 = vrot.lane.b32.xlu0 %v1887_v48, %s1800_s10 }
 0x529   :  { %v561_v38 = vpop.xlane.xlu0 %560 }
 0x52a   :  { %1754 = vrcp.f32 %v561_v38 }
 0x533   :  { %v564_v40 = vpop.xlane.xlu1 %563 }
 0x534   :  { %v1755_v43 = vpop.eup %1754  ;;  %1756 = vrcp.f32 %v564_v40 }
 0x535   :  { %v591_v41 = vmul.f32 %v1755_v43, %v1916_v27 }
 0x537   :  { %600 = vrot.lane.b32.xlu1 %v591_v41, %s1798_s9 }
 0x53e   :  { %v1757_v42 = vpop.eup %1756 }
 0x53f   :  { %v592_v44 = vmul.f32 %v1757_v42, %v1920_v30 }
 0x541   :  { %678 = vrot.lane.b32.xlu1 %v592_v44, %s1798_s9 }
 0x572   :  { %v567_v46 = vpop.xlane.xlu0 %566 }
 0x573   :  { %1758 = vrcp.f32 %v567_v46 }
 0x576   :  { %v570_v16 = vpop.xlane.xlu0 %569 }
 0x577   :  { %1760 = vrcp.f32 %v570_v16 }
 0x57a   :  { %v573_v17 = vpop.xlane.xlu0 %572 }
 0x57b   :  { %1762 = vrcp.f32 %v573_v17 }
 0x57d   :  { %v1759_v48 = vpop.eup %1758 }
 0x57e   :  { %v579_v18 = vpop.xlane.xlu0 %578  ;;  %v593_v19 = vmul.f32 %v1759_v48, %v1924_v52  ;;  %v1223_v52 = vld [vmem:[%s2053_s3] sm:$0xff] }
 0x57f   :  { %v576_v20 = vpop.xlane.xlu1 %575 }
 0x580   :  { %1764 = vrcp.f32 %v576_v20  ;;  %756 = vrot.lane.b32.xlu1 %v593_v19, %s1798_s9 }
 0x581   :  { %v1761_v21 = vpop.eup %1760  ;;  %1766 = vrcp.f32 %v579_v18 }
 0x582   :  { %v603_v22 = vpop.permute.xlu0 %602  ;;  %v594_v23 = vmul.f32 %v1761_v21, %v1928_v57  ;;  %v1224_v57 = vld [vmem:[%s2053_s3 + $0x8] sm:$0xff] }
 0x583   :  { %v582_v24 = vpop.xlane.xlu1 %581  ;;  %1649 = vmatpush3.msra.mxu0 %v603_v22 }
 0x584   :  { %834 = vrot.lane.b32.xlu1 %v594_v23, %s1798_s9  ;;  %1653 = vmatprep.subr.mxu0 %v1799_v15  ;;  %1768 = vrcp.f32 %v582_v24 }
 0x585   :  { %v1763_v25 = vpop.eup %1762 }
 0x586   :  { %v759_v26 = vpop.permute.xlu0 %758  ;;  %v595_v27 = vmul.f32 %v1763_v25, %v1932_v59 }
 0x587   :  { %1659 = vmatpush3.msra.mxu1 %v759_v26  ;;  %v681_v34 = vpop.permute.xlu1 %680 }
 0x588   :  { %912 = vrot.lane.b32.xlu1 %v595_v27, %s1798_s9  ;;  %1668 = vmatprep.subr.mxu1 %v1799_v15 }
 0x58a   :  { %v1765_v28 = vpop.eup %1764  ;;  %v837_v37 = vpop.permute.xlu0 %836 }
 0x58b   :  { %v596_v29 = vmul.f32 %v1765_v28, %v1938_v61  ;;  %v1767_v30 = vpop.eup %1766  ;;  %v1225_v61 = vld [vmem:[%s2053_s3 + $0x10] sm:$0xff] }
 0x58c   :  { %v597_v31 = vmul.f32 %v1767_v30, %v1936_v60 }
 0x58d   :  { %990 = vrot.lane.b32.xlu1 %v596_v29, %s1798_s9 }
 0x58e   :  { %v1769_v32 = vpop.eup %1768  ;;  %v915_v39 = vpop.permute.xlu0 %914 }
 0x58f   :  { %v598_v33 = vmul.f32 %v1769_v32, %v1944_v62 }
 0x591   :  { %1068 = vrot.lane.b32.xlu1 %v597_v31, %s1798_s9 }
 0x592   :  { %v993_v47 = vpop.permute.xlu0 %992 }
 0x595   :  { %1146 = vrot.lane.b32.xlu1 %v598_v33, %s1798_s9 }
 0x596   :  { %v1071_v50 = vpop.permute.xlu0 %1070 }
 0x59a   :  { %v1149_v54 = vpop.permute.xlu0 %1148 }
 0x5a9   :  { %v601_v35 = vpop.permute.xlu1 %600 }
 0x5aa   :  { %1651 = vmatmul.mubr.msk.f32.vlgmr.msra.gmra.mrb[2].mxu0 %vm558_vm2, %v601_v35 }
 0x5ab   :  { %1654 = vmatpush3.msra.mxu0 %v681_v34  ;;  %1655 = vmatprep.mubr.msk.f32.mxu0 %vm1801_vm3, %v1799_v15 }
 0x5ac   :  { %1663 = vmatprep.subr.mxu0 %v1799_v15 }
 0x5b3   :  { %v679_v36 = vpop.permute.xlu1 %678 }
 0x5b4   :  { %1656 = vmatmul.mubr.msk.f32.vlgmr.msra.gmra.mrb[4].mxu0 %vm558_vm2, %v679_v36 }
 0x5b5   :  { %1664 = vmatpush3.msra.mxu0 %v837_v37  ;;  %1665 = vmatprep.mubr.msk.f32.mxu0 %vm1801_vm3, %v1799_v15 }
 0x5b6   :  { %1673 = vmatprep.subr.mxu0 %v1799_v15 }
 0x5f2   :  { %v757_v45 = vpop.permute.xlu1 %756 }
 0x5f3   :  { %1661 = vmatmul.mubr.msk.f32.vlgmr.msra.gmra.mrb[0].mxu1 %vm558_vm2, %v757_v45 }
 0x5f4   :  { %1669 = vmatpush3.msra.mxu1 %v915_v39  ;;  %1670 = vmatprep.mubr.msk.f32.mxu1 %vm1801_vm3, %v1799_v15 }
 0x5f5   :  { %1678 = vmatprep.subr.mxu1 %v1799_v15 }
 0x5f6   :  { %v835_v49 = vpop.permute.xlu1 %834 }
 0x5f7   :  { %1666 = vmatmul.mubr.msk.f32.vlgmr.msra.gmra.mrb[6].mxu0 %vm558_vm2, %v835_v49 }
 0x5f8   :  { %1674 = vmatpush3.msra.mxu0 %v993_v47  ;;  %1675 = vmatprep.mubr.msk.f32.mxu0 %vm1801_vm3, %v1799_v15 }
 0x5f9   :  { %1683 = vmatprep.subr.mxu0 %v1799_v15 }
 0x5fa   :  { %v913_v51 = vpop.permute.xlu1 %912 }
 0x5fb   :  { %1671 = vmatmul.mubr.msk.f32.vlgmr.msra.gmra.mrb[2].mxu1 %vm558_vm2, %v913_v51 }
 0x5fc   :  { %1679 = vmatpush3.msra.mxu1 %v1071_v50  ;;  %1680 = vmatprep.mubr.msk.f32.mxu1 %vm1801_vm3, %v1799_v15 }
 0x5fd   :  { %1688 = vmatprep.subr.mxu1 %v1223_v52 }
 0x5ff   :  { %v991_v53 = vpop.permute.xlu1 %990 }
 0x600   :  { %1676 = vmatmul.mubr.msk.f32.vlgmr.msra.gmra.mrb[8].mxu0 %vm558_vm2, %v991_v53 }
 0x601   :  { %1684 = vmatpush3.msra.mxu0 %v1149_v54  ;;  %1685 = vmatprep.mubr.msk.f32.mxu0 %vm1801_vm3, %v1799_v15 }
 0x603   :  { %v1069_v55 = vpop.permute.xlu1 %1068 }
 0x604   :  { %1681 = vmatmul.mubr.msk.f32.vlgmr.msra.gmra.mrb[4].mxu1 %vm558_vm2, %v1069_v55 }
 0x605   :  { %1689 = vmatpush3.msra.mxu1 %v1223_v52 }
 0x606   :  { %1693 = vmatprep.subr.mxu1 %v1224_v57 }
 0x607   :  { %v1147_v56 = vpop.permute.xlu1 %1146 }
 0x608   :  { %1686 = vmatmul.mubr.msk.f32.vlgmr.msra.gmra.mrb[10].mxu0 %vm558_vm2, %v1147_v56 }
 0x67d   :  { %v673_v58 = vpop.f32.mrb[2].mxu0 }
 0x67e   :  { %v1652_v59 = vpop.f32.mrb[3].mxu0  ;;  %1690 = vmatprep.mubr.msk.f32.mxu1 %vm558_vm2, %v673_v58 }
 0x687   :  { %v751_v60 = vpop.f32.mrb[4].mxu0 }
 0x688   :  { %v1657_v62 = vpop.f32.mrb[5].mxu0  ;;  %1691 = vmatmul.mubr.msk.f32.vlgmr.msra.gmra.mrb[6].mxu1 %vm558_vm2, %v751_v60 }
 0x689   :  { %1694 = vmatpush3.msra.mxu1 %v1224_v57 }
 0x68a   :  { %1698 = vmatprep.subr.mxu1 %v1225_v61 }
 0x6c6   :  { %v829_v63 = vpop.f32.mrb[0].mxu1 }
 0x6c7   :  { %v1662_v0 = vpop.f32.mrb[1].mxu1  ;;  %1695 = vmatprep.mubr.msk.f32.mxu1 %vm558_vm2, %v829_v63 }
 0x6ca   :  { %v907_v1 = vpop.f32.mrb[6].mxu0 }
 0x6cb   :  { %v1667_v3 = vpop.f32.mrb[7].mxu0  ;;  %1696 = vmatmul.mubr.msk.f32.vlgmr.msra.gmra.mrb[6].mxu1 %vm558_vm2, %v907_v1 }
 0x6cc   :  { %1699 = vmatpush3.msra.mxu1 %v1225_v61 }
 0x6cd   :  { %1703 = vmatprep.subr.mxu1 %v1226_v2 }
 0x6ce   :  { %v985_v4 = vpop.f32.mrb[2].mxu1 }
 0x6cf   :  { %v1672_v5 = vpop.f32.mrb[3].mxu1  ;;  %1700 = vmatprep.mubr.msk.f32.mxu1 %vm558_vm2, %v985_v4 }
 0x6d3   :  { %v1063_v6 = vpop.f32.mrb[8].mxu0 }
 0x6d4   :  { %v1677_v7 = vpop.f32.mrb[9].mxu0  ;;  %1701 = vmatmul.mubr.msk.f32.vlgmr.msra.gmra.mrb[6].mxu1 %vm558_vm2, %v1063_v6 }
 0x6d5   :  { %1704 = vmatpush3.msra.mxu1 %v1226_v2 }
 0x6d7   :  { %v1141_v8 = vpop.f32.mrb[4].mxu1 }
 0x6d8   :  { %v1682_v9 = vpop.f32.mrb[5].mxu1  ;;  %1705 = vmatprep.mubr.msk.f32.mxu1 %vm558_vm2, %v1141_v8 }
 0x6db   :  { %v1219_v10 = vpop.f32.mrb[10].mxu0 }
 0x6dc   :  { %v1687_v11 = vpop.f32.mrb[11].mxu0  ;;  %1706 = vmatmul.mubr.msk.f32.vlgmr.msra.gmra.mrb[6].mxu1 %vm558_vm2, %v1219_v10 }
 0x7af   :  { %v1707_v13 = vpop.f32.mrb[6].mxu1 }
 0x7b0   :  { %v1716_v14 = vadd.f32 %v1707_v13, %v1596_v12  ;;  %v1552_v15 = vpop.f32.mrb[7].mxu1 }
 0x7b1   :  { %v1717_v38 = vadd.f32 %v1596_v12, %v1552_v15 }
 0x7b2   :  { %1564 = vst.msk [vmem:[#allocation2 + $0x8] sm:$0xff] %vm24_vm0, %v1716_v14 }
 0x7b3   :  { %1563 = vst.msk [vmem:[#allocation2] sm:$0xff] %vm24_vm0, %v1717_v38 }
 0x7b4   :  { %1781 = shalt.err (!%p1778_p4)
}
 0x7b5   :  { %s1782_s23 = scalar_lea.hbm %s2054_s4, 256 }
 0x7b6   :  { %p1783_p5 = scmp.ne.s32.totalorder %s2054_s4, %s1782_s23  ;;  %p1786_p6 = scmp.lt.u32.totalorder %s1782_s23, %s2054_s4 }
 0x7b8   :  { %p1788_p7 = pnand %p1786_p6, %p1783_p5 }
 0x7ba   :  { %1791 = shalt.err (!%p1788_p7)
}
 0x7bb   :  { %s1803_s2 = smov 128  }
 0x7bc   :  { %1576 = dma.vmem_to_hbm [thread:$0]  %s1571_s20, 256, %s2054_s4, [#allocation3], %s1803_s2, %s1803_s2, %s1797_s8  }
 0x7bd   :  { %1792 = dma.done.wait [#allocation3], 256  }
 0x7be   :  { %1793 = vsyncadd [#allocation3], 4294967040 }
 0x7bf   :  { %1580 = vsyncpa [#allocation3], 1 }

</bundles_post_ra>
